<compile_context>
chip_gen: v7x
topology: tpu7x:2x2x1
jax: 0.10.0
libtpu: 0.0.40
codegen_flags: <defaults>
</compile_context>

<pallas_src>
import functools

import jax
import jax.numpy as jnp
from jax.experimental import pallas as pl
from jax.experimental.pallas import tpu as pltpu


def _round_up(x: int, m: int) -> int:
    return ((x + m - 1) // m) * m


def _vmem_limit_bytes() -> int:
    """Generation-aware scoped-VMEM budget.

    v5e/v6e have 128 MiB physical VMEM -> 64 MiB scoped budget;
    v7x has 64 MiB per TensorCore      -> 40 MiB scoped budget.
    """
    try:
        phys = int(pltpu.get_tpu_info().vmem_capacity_bytes)
    except Exception:  # query unavailable -> assume the smallest (v7x-class) VMEM
        phys = 64 * 1024 * 1024
    if phys >= 96 * 1024 * 1024:
        return 64 * 1024 * 1024
    return 40 * 1024 * 1024


def _pick_tile_n(n: int, c: int, stream_itemsize: int, vmem_limit: int) -> int:
    """Largest batch tile (multiple of 256) fitting a padding-aware VMEM budget.

    Every VMEM buffer is modeled with its real (8,128) tile padding: the class
    axis (sublanes) rounds up to 8, lane axes to 128, and the int32 targets /
    width-1 proto-factor blocks carry their full padded footprint.
    """
    c8 = _round_up(c, 8)
    c128 = _round_up(c, 128)
    # Resident operands (constant index_map, still double-buffered by default)
    # G [C,C], proto_factor [C,1], plus double-buffered (8,128) output blocks.
    resident = 2 * c8 * c128 * 4 + 2 * c8 * 128 * 4 + 2 * 8 * 128 * 4
    budget = int(vmem_limit * 0.6) - resident  # headroom for compiler temps/spills
    # Per batch column (lane) in the tile:
    #   streamed logits^T, double-buffered:            2 * c8 * itemsize
    #   streamed int32 targets [1,TN], sublane-padded:  2 * 8 * 4
    #   ~8 f32 [C,TN] body temporaries:                 8 * c8 * 4
    #   ~8 f32 [1,TN] body temporaries:                 8 * 8 * 4
    per_col = 2 * c8 * stream_itemsize + 2 * 8 * 4 + 8 * c8 * 4 + 8 * 8 * 4
    tile = budget // max(per_col, 1)
    cap = 2048 if vmem_limit >= 64 * 1024 * 1024 else 1024  # v5e/v6e vs v7x
    tile = max(256, min(cap, (tile // 256) * 256))
    return min(tile, _round_up(max(n, 1), 256))


def _cpa_loss_kernel(logitsT_ref, tgt_ref, g_ref, pf_ref, out_ref, *, eps: float):
    # Lane-dense streamed tile: classes on sublanes, batch on lanes.
    x = logitsT_ref[...].astype(jnp.float32)       # [C, TN] (input may be bf16)
    tgt = tgt_ref[...]                             # [1, TN] int32 (-1 => padded column)
    G = g_ref[...]                                 # [C, C]  f32 global factor (resident)
    pf = pf_ref[...]                               # [C, 1]  f32 proto factor (resident)

    c, tn = x.shape

    # one-hot(targets)^T: padded columns (target == -1) become all-zero.
    row = jax.lax.broadcasted_iota(jnp.int32, (c, tn), 0)
    t = (row == tgt).astype(jnp.float32)           # [C, TN]

    # numerically-stabilized exp(logits), reducing over the class (sublane) axis.
    m = jnp.max(x, axis=0, keepdims=True)          # [1, TN]
    e = jnp.exp(x - m)                             # [C, TN]

    # denom^T[i, n] = sum_j G[i, j] * (1 - t[n, j]) * e[n, j] + e[n, i]
    # -> clean [C,C] x [C,TN] MXU matmul with a wide lane-dense output.
    e_masked = (1.0 - t) * e
    denom = jax.lax.dot_general(
        G, e_masked,
        dimension_numbers=(((1,), (0,)), ((), ())),
        preferred_element_type=jnp.float32) + e    # [C, TN]

    # Target-column-only NLL: only the target row survives the one-hot weighting,
    # so gather via one-hot + sublane reduce and run divide / -log on [1, TN].
    e_t = jnp.sum(t * e, axis=0, keepdims=True)        # [1, TN]
    d_t = jnp.sum(t * denom, axis=0, keepdims=True)    # [1, TN]
    pf_t = jnp.sum(t * pf, axis=0, keepdims=True)      # [1, TN] (0 for padded cols)

    sigma_t = e_t / (d_t + eps)
    nll_t = -jnp.log(sigma_t + eps)                    # exact reference semantics

    partial = jnp.sum(pf_t * nll_t)                    # padded cols contribute 0

    # Lane-dense partial-sum block; wrapper picks [.., 0, 0] and reduces.
    out_ref[...] = jnp.full(out_ref.shape, partial, dtype=jnp.float32)


def cpa_loss(logits, targets, local_proto, global_proto, class_counts,
             beta: float = 0.8, tau: float = 3.0, eps: float = 1e-6,
             tile_n: int | None = None, stream_dtype=None):
    """CPA loss forward.  Batch-independent parameter prep (global_factor,
    prototype cosine factor) runs in plain JAX; the batch-streaming hot path
    runs in a single gridded, lane-dense Pallas kernel."""
    # --- global_factor from class_counts (module __init__ logic) ---
    class_counts = jnp.asarray(class_counts, jnp.float32)
    cond = class_counts[:, None] > class_counts[None, :]
    trues = (class_counts[None, :] / class_counts[:, None]) ** beta
    global_factor = jnp.where(cond, trues, jnp.ones_like(trues)).astype(jnp.float32)  # [C, C]

    # --- prototype cosine factor (batch-independent -> hoisted out of the kernel) ---
    lp = local_proto.astype(jnp.float32)
    gp = jax.lax.stop_gradient(global_proto.astype(jnp.float32))   # matches .detach()
    cos = jnp.sum(lp * gp, axis=-1) / (
        jnp.linalg.norm(lp, axis=-1) * jnp.linalg.norm(gp, axis=-1) + eps)
    proto_factor = ((1.0 + tau) / (cos + tau)).reshape(-1, 1).astype(jnp.float32)  # [C, 1]

    n, c = logits.shape
    # NOTE: for very large C (C*C*4B approaching scoped VMEM) G would need a second
    # grid axis with a denom accumulator (and pl.Buffered(1) residents); not needed
    # at typical class counts.
    vmem_limit = _vmem_limit_bytes()
    stream = logits if stream_dtype is None else logits.astype(stream_dtype)
    if tile_n is None:
        tile_n = _pick_tile_n(n, c, jnp.dtype(stream.dtype).itemsize, vmem_limit)
    tile_n = max(128, (tile_n // 128) * 128)   # lane-axis tile must be a 128-multiple

    n_pad = _round_up(n, tile_n)
    num_tiles = n_pad // tile_n

    # Lane-dense layout: pad the batch, transpose once (layout plumbing, done by XLA).
    # Padded logits columns -> 0 (harmless); padded targets -> -1 (zero one-hot).
    logits_t = jnp.pad(stream, ((0, n_pad - n), (0, 0))).T                       # [C, n_pad]
    tgt_row = jnp.pad(targets.astype(jnp.int32), (0, n_pad - n),
                      constant_values=-1).reshape(1, n_pad)                      # [1, n_pad]

    kernel = functools.partial(_cpa_loss_kernel, eps=eps)
    partials = pl.pallas_call(
        kernel,
        out_shape=jax.ShapeDtypeStruct((num_tiles, 8, 128), jnp.float32),
        grid=(num_tiles,),
        in_specs=[
            pl.BlockSpec((c, tile_n), lambda i: (0, i)),   # streamed logits^T tile
            pl.BlockSpec((1, tile_n), lambda i: (0, i)),   # streamed targets row
            pl.BlockSpec((c, c), lambda i: (0, 0)),        # resident G (DMA'd once)
            pl.BlockSpec((c, 1), lambda i: (0, 0)),        # resident proto_factor
        ],
        out_specs=pl.BlockSpec((1, 8, 128), lambda i: (i, 0, 0)),
        compiler_params=pltpu.CompilerParams(
            dimension_semantics=("parallel",),             # shards tiles across v7x's 2 TCs
            vmem_limit_bytes=vmem_limit,
        ),
    )(logits_t, tgt_row, global_factor, proto_factor)

    return jnp.sum(partials[:, 0, 0]) / n


def _reference(logits, targets, local_proto, global_proto, class_counts,
               beta=0.8, tau=3.0, eps=1e-6):
    """Plain-JAX reference mirroring the PyTorch forward, for validation."""
    class_counts = jnp.asarray(class_counts, jnp.float32)
    cond = class_counts[:, None] > class_counts[None, :]
    trues = (class_counts[None, :] / class_counts[:, None]) ** beta
    G = jnp.where(cond, trues, jnp.ones_like(trues))
    C = class_counts.shape[0]
    logits = logits.astype(jnp.float32)
    t = jax.nn.one_hot(targets, C, dtype=jnp.float32)
    m = logits.max(axis=-1)
    z = logits - m[:, None]
    num = jnp.exp(z)
    den = ((1 - t)[:, None, :] * G[None, :, :] * jnp.exp(z)[:, None, :]).sum(-1) + jnp.exp(z)
    sigma = num / (den + eps)
    ns = jnp.linalg.norm(local_proto, axis=-1)
    ng = jnp.linalg.norm(global_proto, axis=-1)
    cos = jnp.sum(local_proto * global_proto, axis=-1) / (ns * ng + eps)
    pf = (1 + tau) / (cos + tau)
    loss = (-pf[None, :] * t * jnp.log(sigma + eps)).sum(-1)
    return loss.mean()


if __name__ == "__main__":
    C, D = 4, 64
    class_counts = [100.0, 50.0, 20.0, 10.0]

    key = jax.random.PRNGKey(0)
    k1, k2, k3, k4, k5, k6 = jax.random.split(key, 6)

    local_proto = jax.random.normal(k3, (C, D), dtype=jnp.float32)
    global_proto = jax.random.normal(k4, (C, D), dtype=jnp.float32)

    # --- case 1: small demo shape (auto tile size, single grid step) ---
    N = 8
    logits = jax.random.normal(k1, (N, C), dtype=jnp.float32)
    targets = jax.random.randint(k2, (N,), 0, C, dtype=jnp.int32)

    out = jax.block_until_ready(
        cpa_loss(logits, targets, local_proto, global_proto, class_counts))
    ref = _reference(logits, targets, local_proto, global_proto, class_counts)
    assert jnp.allclose(out, ref, rtol=1e-5, atol=1e-5), (out, ref)

    # --- case 2: multi-tile grid + ragged batch (exercises padding / partial sums) ---
    N2 = 300
    logits2 = jax.random.normal(k5, (N2, C), dtype=jnp.float32)
    targets2 = jax.random.randint(k6, (N2,), 0, C, dtype=jnp.int32)

    out2 = jax.block_until_ready(
        cpa_loss(logits2, targets2, local_proto, global_proto, class_counts, tile_n=128))
    ref2 = _reference(logits2, targets2, local_proto, global_proto, class_counts)
    assert jnp.allclose(out2, ref2, rtol=1e-5, atol=1e-5), (out2, ref2)

    print("KERNEL_OK")
</pallas_src>

<mosaic_0001>
module attributes {stable_mosaic.version = 11 : i64} {
  func.func @_cpa_loss_kernel(%arg0: i32, %arg1: memref<4x256xf32, #tpu.memory_space<vmem>>, %arg2: memref<1x256xi32, #tpu.memory_space<vmem>>, %arg3: memref<4x4xf32, #tpu.memory_space<vmem>>, %arg4: memref<4x1xf32, #tpu.memory_space<vmem>>, %arg5: memref<1x8x128xf32, #tpu.memory_space<vmem>>) attributes {dimension_semantics = [#tpu.dimension_semantics<parallel>], iteration_bounds = array<i64: 1>, scalar_prefetch = 0 : i64, scratch_operands = 0 : i64, tpu.core_type = #tpu.core_type<tc>, window_params = [{transform_indices = @transform_0, window_bounds = array<i64: 4, 256>}, {transform_indices = @transform_1, window_bounds = array<i64: 1, 256>}, {pipeline_mode = #tpu.pipeline_mode<synchronous>, transform_indices = @transform_2, window_bounds = array<i64: 4, 4>}, {pipeline_mode = #tpu.pipeline_mode<synchronous>, transform_indices = @transform_3, window_bounds = array<i64: 4, 1>}, {transform_indices = @transform_4, window_bounds = array<i64: 1, 8, 128>}]} {
    %c0 = arith.constant 0 : index
    %c0_0 = arith.constant 0 : index
    %0 = vector.load %arg1[%c0, %c0_0] : memref<4x256xf32, #tpu.memory_space<vmem>>, vector<4x256xf32>
    %c0_1 = arith.constant 0 : index
    %c0_2 = arith.constant 0 : index
    %1 = vector.load %arg2[%c0_1, %c0_2] : memref<1x256xi32, #tpu.memory_space<vmem>>, vector<1x256xi32>
    %c0_3 = arith.constant 0 : index
    %c0_4 = arith.constant 0 : index
    %2 = vector.load %arg3[%c0_3, %c0_4] : memref<4x4xf32, #tpu.memory_space<vmem>>, vector<4x4xf32>
    %c0_5 = arith.constant 0 : index
    %c0_6 = arith.constant 0 : index
    %3 = vector.load %arg4[%c0_5, %c0_6] : memref<4x1xf32, #tpu.memory_space<vmem>>, vector<4x1xf32>
    %4 = tpu.iota {dimensions = array<i32: 0>} : vector<4x256xi32>
    %5 = vector.broadcast %1 : vector<1x256xi32> to vector<4x256xi32>
    %6 = arith.cmpi eq, %4, %5 : vector<4x256xi32>
    %7 = arith.extui %6 : vector<4x256xi1> to vector<4x256xi32>
    %8 = arith.sitofp %7 : vector<4x256xi32> to vector<4x256xf32>
    %cst = arith.constant dense<0xFF800000> : vector<256xf32>
    %9 = vector.multi_reduction <maximumf>, %0, %cst [0] : vector<4x256xf32> to vector<256xf32>
    %10 = vector.shape_cast %9 : vector<256xf32> to vector<1x256xf32>
    %11 = vector.broadcast %10 : vector<1x256xf32> to vector<4x256xf32>
    %12 = arith.subf %0, %11 : vector<4x256xf32>
    %13 = math.exp %12 : vector<4x256xf32>
    %cst_7 = arith.constant 1.000000e+00 : f32
    %14 = vector.broadcast %cst_7 : f32 to vector<4x256xf32>
    %15 = arith.subf %14, %8 : vector<4x256xf32>
    %16 = arith.mulf %15, %13 : vector<4x256xf32>
    %cst_8 = arith.constant dense<0.000000e+00> : vector<4x256xf32>
    %17 = tpu.matmul %2, %16, %cst_8 {dimension_numbers = #tpu.dot_dimension_numbers<[1], [0], [0], [1], [0, 0, 1, 1], [], []>} : vector<4x4xf32>, vector<4x256xf32>, vector<4x256xf32> -> vector<4x256xf32>
    %18 = arith.addf %17, %13 : vector<4x256xf32>
    %19 = arith.mulf %8, %13 : vector<4x256xf32>
    %cst_9 = arith.constant dense<0.000000e+00> : vector<256xf32>
    %20 = vector.multi_reduction <add>, %19, %cst_9 [0] : vector<4x256xf32> to vector<256xf32>
    %21 = vector.shape_cast %20 : vector<256xf32> to vector<1x256xf32>
    %22 = arith.mulf %8, %18 : vector<4x256xf32>
    %cst_10 = arith.constant dense<0.000000e+00> : vector<256xf32>
    %23 = vector.multi_reduction <add>, %22, %cst_10 [0] : vector<4x256xf32> to vector<256xf32>
    %24 = vector.shape_cast %23 : vector<256xf32> to vector<1x256xf32>
    %25 = vector.broadcast %3 : vector<4x1xf32> to vector<4x256xf32>
    %26 = arith.mulf %8, %25 : vector<4x256xf32>
    %cst_11 = arith.constant dense<0.000000e+00> : vector<256xf32>
    %27 = vector.multi_reduction <add>, %26, %cst_11 [0] : vector<4x256xf32> to vector<256xf32>
    %28 = vector.shape_cast %27 : vector<256xf32> to vector<1x256xf32>
    %cst_12 = arith.constant 9.99999997E-7 : f32
    %29 = vector.broadcast %cst_12 : f32 to vector<1x256xf32>
    %30 = arith.addf %24, %29 : vector<1x256xf32>
    %31 = arith.divf %21, %30 : vector<1x256xf32>
    %cst_13 = arith.constant 9.99999997E-7 : f32
    %32 = vector.broadcast %cst_13 : f32 to vector<1x256xf32>
    %33 = arith.addf %31, %32 : vector<1x256xf32>
    %34 = math.log %33 : vector<1x256xf32>
    %cst_14 = arith.constant 0.000000e+00 : f32
    %35 = vector.broadcast %cst_14 : f32 to vector<1x256xf32>
    %36 = arith.subf %35, %34 : vector<1x256xf32>
    %37 = arith.mulf %28, %36 : vector<1x256xf32>
    %38 = vector.shape_cast %37 : vector<1x256xf32> to vector<1x1x256xf32>
    %cst_15 = arith.constant dense<0.000000e+00> : vector<1xf32>
    %39 = vector.multi_reduction <add>, %38, %cst_15 [1, 2] : vector<1x1x256xf32> to vector<1xf32>
    %40 = vector.shape_cast %39 : vector<1xf32> to vector<1x1x1xf32>
    %41 = vector.extract %40[0, 0, 0] : f32 from vector<1x1x1xf32>
    %42 = vector.broadcast %41 : f32 to vector<1x8x128xf32>
    %c0_16 = arith.constant 0 : index
    %c0_17 = arith.constant 0 : index
    %c0_18 = arith.constant 0 : index
    %43 = vector.load %arg5[%c0_16, %c0_17, %c0_18] : memref<1x8x128xf32, #tpu.memory_space<vmem>>, vector<1x8x128xf32>
    tpu.vector_store %arg5[%c0_16, %c0_17, %c0_18], %42 {strides = array<i32>} : memref<1x8x128xf32, #tpu.memory_space<vmem>>, vector<1x8x128xf32>,
    return
  }
  func.func @transform_0(%arg0: i32) -> (i32, i32) {
    %c0_i32 = arith.constant 0 : i32
    %c0_i32_0 = arith.constant 0 : i32
    return %c0_i32, %arg0 : i32, i32
  }
  func.func @transform_1(%arg0: i32) -> (i32, i32) {
    %c0_i32 = arith.constant 0 : i32
    %c0_i32_0 = arith.constant 0 : i32
    return %c0_i32, %arg0 : i32, i32
  }
  func.func @transform_2(%arg0: i32) -> (i32, i32) {
    %c0_i32 = arith.constant 0 : i32
    %c0_i32_0 = arith.constant 0 : i32
    %c0_i32_1 = arith.constant 0 : i32
    return %c0_i32, %c0_i32_0 : i32, i32
  }
  func.func @transform_3(%arg0: i32) -> (i32, i32) {
    %c0_i32 = arith.constant 0 : i32
    %c0_i32_0 = arith.constant 0 : i32
    %c0_i32_1 = arith.constant 0 : i32
    return %c0_i32, %c0_i32_0 : i32, i32
  }
  func.func @transform_4(%arg0: i32) -> (i32, i32, i32) {
    %c0_i32 = arith.constant 0 : i32
    %c0_i32_0 = arith.constant 0 : i32
    %c0_i32_1 = arith.constant 0 : i32
    return %arg0, %c0_i32, %c0_i32_0 : i32, i32, i32
  }
}

</mosaic_0001>

<bundles_post_ra>
// kernel: tpu_custom_call.1
= control target key start
LH: loop header
LB: loop body
LE: loop exit
PB: predicated region body
PF: predicated region fallthrough
CT: control target
= control target key end

     0   :  { %9 = vsyncpa [#allocation3], 0  ;;  %s405_s0 = inlined_call_operand.hbm [shape: f32[4,256], index: 0, kind: input, shape index: {}]   ;;  %s406_s1 = inlined_call_operand.vmem [shape: s32[1,256], index: 1, kind: input, shape index: {}]   ;;  %s407_s2 = inlined_call_operand.vmem [shape: f32[4,4], index: 2, kind: input, shape index: {}]   ;;  %s408_s3 = inlined_call_operand.vmem [shape: f32[4,1], index: 3, kind: input, shape index: {}]   ;;  %s409_s4 = inlined_call_operand.hbm [shape: f32[1,8,128], index: 4, kind: output, shape index: {}]  }
   0x1   :  { %10 = vsyncpa [#allocation4], 0  ;;  %s333_s15 = smov [#allocation2]   ;;  %s285_s19 = scalar_lea.hbm %s405_s0, 128 }
   0x2   :  { %s17_s16 = sshll.u32 %s333_s15, 4  ;;  %p286_p0 = scmp.ne.s32.totalorder %s405_s0, %s285_s19  ;;  %s18_s16 = int_to_ptr.vmem [resolvable:$true] %s17_s16 }
   0x3   :  { %p289_p1 = scmp.lt.u32.totalorder %s285_s19, %s405_s0 }
   0x5   :  { %p291_p2 = pnand %p289_p1, %p286_p0 }
   0x7   :  { %294 = shalt.err (!%p291_p2)
}
   0x8   :  { %s295_s24 = scalar_lea.vmem %s18_s16, 128  ;;  %p300_p4 = scmp.lt.s32.totalorder %s18_s16, %s18_s16 }
   0x9   :  { %p296_p3 = scmp.ne.s32.totalorder %s18_s16, %s295_s24  ;;  %p301_p5 = scmp.lt.s32.totalorder %s295_s24, %s295_s24 }
   0xb   :  { %p302_p6 = por %p301_p5, %p300_p4 }
   0xd   :  { %p303_p7 = pnand %p302_p6, %p296_p3 }
   0xf   :  { %306 = shalt.err (!%p303_p7)
}
  0x10   :  { %20 = dma.hbm_to_vmem [thread:$0]  %s405_s0, 128, %s18_s16, [#allocation3]  }
  0x11   :  { %329 = dma.done.wait [#allocation3], 128  }
  0x12   :  { %330 = vsyncadd [#allocation3], 4294967168  ;;  %v334_v0 = vmov 0.0   ;;  %v335_v1 = vmov 0   ;;  %vm53_vm0 = vcmask 1043456   ;;  %v30_v2 = vld [vmem:[#allocation2] sm:$0xff]  ;;  %v34_v12 = vlaneseq }
  0x13   :  { %156 = vmatprep.mubr.f32.mxu0 %v334_v0  ;;  %273 = vset.pattern.permute.xlu0 %v335_v1  ;;  %v51_v3 = vcombine.high %v30_v2, %v30_v2  ;;  %v54_v4 = vsel %vm53_vm0, %v30_v2, -inf  ;;  %v33_v5 = vld [vmem:[%s408_s3] sm:$0xf]  ;;  %vm82_vm3 = vcmask 31744   ;;  %vm232_vm4 = vcmask 1040384  }
  0x14   :  { %v55_v6 = vrot.slane %v54_v4, 4  ;;  %197 = vperm.xlu0 %273, %v33_v5   ;;  %v35_v17 = vshrl.u32 %v34_v12, 7  ;;  %v31_v23 = vld [vmem:[%s406_s1] sm:$0x3]  ;;  %s336_s1 = smov [#allocation5]  }
  0x15   :  { %v61_v7 = vsel %vm53_vm0, %v51_v3, -inf  ;;  %v32_v37 = vld [vmem:[%s407_s2] sm:$0xf]  ;;  %s253_s2 = sshll.u32 %s336_s1, 4  ;;  %s254_s2 = int_to_ptr.vmem [resolvable:$true] %s253_s2 }
  0x16   :  { %v56_v8 = vmax.f32 %v54_v4, %v55_v6  ;;  %v62_v9 = vrot.slane %v61_v7, 4  ;;  %v38_v21 = vsub.s32 0, %v35_v17  ;;  %v42_v24 = vsub.s32 1, %v35_v17  ;;  %s307_s6 = scalar_lea.vmem %s254_s2, 128  ;;  %p312_p9 = scmp.lt.s32.totalorder %s254_s2, %s254_s2 }
  0x17   :  { %p308_p8 = scmp.ne.s32.totalorder %s254_s2, %s307_s6  ;;  %p313_p10 = scmp.lt.s32.totalorder %s307_s6, %s307_s6 }
  0x18   :  { %v57_v10 = vrot.slane %v56_v8, 2  ;;  %v63_v11 = vmax.f32 %v61_v7, %v62_v9  ;;  %v39_v26 = vrot.slane %v31_v23, %v38_v21  ;;  %v43_v28 = vrot.slane %v31_v23, %v42_v24 }
  0x19   :  { %p314_p11 = por %p313_p10, %p312_p9 }
  0x1a   :  { %v58_v13 = vmax.f32 %v56_v8, %v57_v10  ;;  %v64_v14 = vrot.slane %v63_v11, 2  ;;  %vm44_vm1 = vcmp.eq.s32.totalorder %v35_v17, %v39_v26  ;;  %vm45_vm2 = vcmp.eq.s32.totalorder %v35_v17, %v43_v28 }
  0x1b   :  { %v262_v29 = vsel %vm44_vm1, 1.0, %v334_v0  ;;  %v263_v30 = vsel %vm45_vm2, 1.0, %v334_v0  ;;  %p315_p12 = pnand %p314_p11, %p308_p8 }
  0x1c   :  { %v59_v15 = vrot.slane %v58_v13, 1  ;;  %v65_v16 = vmax.f32 %v63_v11, %v64_v14  ;;  %v75_v31 = vsub.f32 1.0, %v262_v29  ;;  %v76_v32 = vsub.f32 1.0, %v263_v30 }
  0x1e   :  { %v60_v18 = vmax.f32 %v58_v13, %v59_v15  ;;  %v66_v19 = vrot.slane %v65_v16, 1 }
  0x20   :  { %v67_v20 = vmax.f32 %v65_v16, %v66_v19 }
  0x22   :  { %v70_v22 = vcombine.low %v60_v18, %v67_v20 }
  0x24   :  { %v72_v25 = vsub.f32 %v30_v2, %v70_v22 }
  0x26   :  { %v73_v27 = vmul.f32 1.442695, %v72_v25 }
  0x28   :  { %275 = vpow2.f32 %v73_v27 }
  0x32   :  { %v276_v33 = vpop.eup %275 }
  0x33   :  { %v78_v34 = vcombine.high %v276_v33, %v276_v33  ;;  %v80_v35 = vmul.f32 %v276_v33, %v75_v31  ;;  %v163_v38 = vmul.f32 %v276_v33, %v262_v29 }
  0x35   :  { %v81_v36 = vmul.f32 %v78_v34, %v76_v32  ;;  %v164_v40 = vmul.f32 %v263_v30, %v78_v34  ;;  %v165_v45 = vsel %vm53_vm0, %v163_v38, 0.0 }
  0x36   :  { %v166_v51 = vrot.slane %v165_v45, 4 }
  0x37   :  { %264 = vmatprep.subr.msk.mxu0 %vm53_vm0, %v81_v36  ;;  %v172_v47 = vsel %vm53_vm0, %v164_v40, 0.0 }
  0x38   :  { %265 = vmatpush1.msk.msra.mxu0 %vm53_vm0, %v80_v35  ;;  %v173_v53 = vrot.slane %v172_v47, 4  ;;  %v167_v58 = vadd.f32 %v166_v51, %v165_v45 }
  0x39   :  { %266 = vmatmul.mubr.msk.f32.vlgmr.msra.gmra.mrb[0].mxu0 %vm82_vm3, %v32_v37 }
  0x3a   :  { %v174_v59 = vadd.f32 %v173_v53, %v172_v47  ;;  %v168_v0 = vrot.slane %v167_v58, 2 }
  0x3c   :  { %v175_v1 = vrot.slane %v174_v59, 2  ;;  %v169_v7 = vadd.f32 %v168_v0, %v167_v58 }
  0x3e   :  { %v176_v8 = vadd.f32 %v175_v1, %v174_v59  ;;  %v170_v11 = vrot.slane %v169_v7, 1 }
  0x40   :  { %v177_v12 = vrot.slane %v176_v8, 1  ;;  %v171_v15 = vadd.f32 %v170_v11, %v169_v7 }
  0x42   :  { %v178_v17 = vadd.f32 %v177_v12, %v176_v8 }
  0x93   :  { %v198_v5 = vpop.permute.xlu0 %197 }
  0x94   :  { %v200_v9 = vmul.f32 %v262_v29, %v198_v5  ;;  %v201_v10 = vmul.f32 %v263_v30, %v198_v5 }
  0x96   :  { %v202_v13 = vsel %vm53_vm0, %v200_v9, 0.0  ;;  %v209_v14 = vsel %vm53_vm0, %v201_v10, 0.0 }
  0x97   :  { %v203_v16 = vrot.slane %v202_v13, 4  ;;  %v210_v18 = vrot.slane %v209_v14, 4 }
  0x99   :  { %v204_v22 = vadd.f32 %v203_v16, %v202_v13  ;;  %v211_v24 = vadd.f32 %v210_v18, %v209_v14 }
  0x9b   :  { %v205_v27 = vrot.slane %v204_v22, 2  ;;  %v212_v28 = vrot.slane %v211_v24, 2 }
 0x10c   :  { %v158_v39 = vpop.f32.mrb[0].mxu0 }
 0x10d   :  { %v159_v41 = vadd.f32 %v276_v33, %v158_v39  ;;  %v160_v42 = vpop.f32.mrb[1].mxu0 }
 0x10e   :  { %v161_v43 = vadd.f32 %v160_v42, %v78_v34 }
 0x10f   :  { %v179_v44 = vmul.f32 %v262_v29, %v159_v41  ;;  %v206_v29 = vadd.f32 %v205_v27, %v204_v22 }
 0x110   :  { %v180_v46 = vmul.f32 %v263_v30, %v161_v43  ;;  %v213_v30 = vadd.f32 %v212_v28, %v211_v24 }
 0x111   :  { %v181_v48 = vsel %vm53_vm0, %v179_v44, 0.0  ;;  %v207_v31 = vrot.slane %v206_v29, 1 }
 0x112   :  { %v182_v49 = vrot.slane %v181_v48, 4  ;;  %v188_v50 = vsel %vm53_vm0, %v180_v46, 0.0  ;;  %v214_v33 = vrot.slane %v213_v30, 1 }
 0x113   :  { %v189_v52 = vrot.slane %v188_v50, 4  ;;  %v208_v37 = vadd.f32 %v207_v31, %v206_v29 }
 0x114   :  { %v183_v54 = vadd.f32 %v182_v49, %v181_v48  ;;  %v215_v39 = vadd.f32 %v214_v33, %v213_v30 }
 0x115   :  { %v190_v55 = vadd.f32 %v189_v52, %v188_v50 }
 0x116   :  { %v184_v56 = vrot.slane %v183_v54, 2 }
 0x117   :  { %v191_v57 = vrot.slane %v190_v55, 2 }
 0x118   :  { %v185_v60 = vadd.f32 %v184_v56, %v183_v54 }
 0x119   :  { %v192_v61 = vadd.f32 %v191_v57, %v190_v55 }
 0x11a   :  { %v186_v62 = vrot.slane %v185_v60, 1 }
 0x11b   :  { %v193_v63 = vrot.slane %v192_v61, 1 }
 0x11c   :  { %v187_v2 = vadd.f32 %v186_v62, %v185_v60 }
 0x11d   :  { %v194_v3 = vadd.f32 %v193_v63, %v192_v61 }
 0x11e   :  { %v216_v4 = vadd.f32 1e-06, %v187_v2 }
 0x11f   :  { %v217_v6 = vadd.f32 1e-06, %v194_v3 }
 0x120   :  { %277 = vrcp.f32 %v216_v4 }
 0x121   :  { %279 = vrcp.f32 %v217_v6 }
 0x12a   :  { %v278_v19 = vpop.eup %277 }
 0x12b   :  { %v280_v20 = vpop.eup %279  ;;  %v219_v21 = vmul.f32 %v278_v19, %v171_v15 }
 0x12c   :  { %v221_v23 = vmul.f32 %v280_v20, %v178_v17 }
 0x12d   :  { %v222_v25 = vadd.f32 1e-06, %v219_v21 }
 0x12e   :  { %v223_v26 = vadd.f32 1e-06, %v221_v23 }
 0x12f   :  { %281 = vlog2.f32 %v222_v25 }
 0x130   :  { %283 = vlog2.f32 %v223_v26 }
 0x139   :  { %v282_v32 = vpop.eup %281 }
 0x13a   :  { %v284_v34 = vpop.eup %283  ;;  %v225_v35 = vmul.f32 0.6931472, %v282_v32 }
 0x13b   :  { %v227_v36 = vmul.f32 0.6931472, %v284_v34 }
 0x13c   :  { %v228_v38 = vsub.f32 0.0, %v225_v35 }
 0x13d   :  { %v229_v40 = vsub.f32 0.0, %v227_v36 }
 0x13e   :  { %v230_v41 = vmul.f32 %v228_v38, %v208_v37 }
 0x13f   :  { %v231_v42 = vmul.f32 %v229_v40, %v215_v39 }
 0x140   :  { %v233_v43 = vsel %vm232_vm4, %v230_v41, 0.0 }
 0x141   :  { %v234_v44 = vsel %vm232_vm4, %v231_v42, 0.0 }
 0x142   :  { %v235_v45 = vadd.f32 %v234_v44, %v233_v43 }
 0x144   :  { %236 = vadd.xlane.f32.xlu0 %v235_v45 }
 0x1d1   :  { %v237_v46 = vpop.xlane.xlu0 %236 }
 0x1d2   :  { %v238_v47 = vrot.slane %v237_v46, 4 }
 0x1d4   :  { %v239_v48 = vadd.f32 %v238_v47, %v237_v46 }
 0x1d6   :  { %v240_v49 = vrot.slane %v239_v48, 2 }
 0x1d8   :  { %v241_v50 = vadd.f32 %v240_v49, %v239_v48 }
 0x1da   :  { %v242_v51 = vrot.slane %v241_v50, 1 }
 0x1dc   :  { %v243_v52 = vadd.f32 %v242_v51, %v241_v50 }
 0x1de   :  { %267 = vpush %v243_v52 }
 0x20f   :  { %s268_s5 = spop %267 }
 0x210   :  { %v245_v53 = vstv %s268_s5 }
 0x211   :  { %246 = vst [vmem:[#allocation5] sm:$0xff] %v245_v53 }
 0x212   :  { %318 = shalt.err (!%p315_p12)
}
 0x213   :  { %s319_s9 = scalar_lea.hbm %s409_s4, 128 }
 0x214   :  { %p320_p13 = scmp.ne.s32.totalorder %s409_s4, %s319_s9  ;;  %p323_p0 = scmp.lt.u32.totalorder %s319_s9, %s409_s4 }
 0x216   :  { %p325_p1 = pnand %p323_p0, %p320_p13 }
 0x218   :  { %328 = shalt.err (!%p325_p1)
}
 0x219   :  { %256 = dma.vmem_to_hbm [thread:$0]  %s254_s2, 128, %s409_s4, [#allocation4]  }
 0x21a   :  { %331 = dma.done.wait [#allocation4], 128  }
 0x21b   :  { %332 = vsyncadd [#allocation4], 4294967168 }
 0x21c   :  { %260 = vsyncpa [#allocation3], 1 }
 0x21d   :  { %261 = vsyncpa [#allocation4], 1 }

</bundles_post_ra>
